<compile_context>
chip_gen: v7x
topology: tpu7x:2x2x1
jax: 0.10.0
libtpu: 0.0.40
codegen_flags: <defaults>
</compile_context>

<pallas_src>
import math

import jax
import jax.numpy as jnp
from jax.experimental import pallas as pl
from jax.experimental.pallas import tpu as pltpu


def _round_up(x, m):
    return ((x + m - 1) // m) * m


def discriminator_kernel(x_ref, w1_ref, b1_ref, w2_ref, b2_ref, w3_ref, b3_ref,
                         out_ref):
    # ---- Layer 1: Linear(D, 512) + LeakyReLU(0.2) --------------------------
    # bf16 operands on the MXU (native on v6e/v7x), f32 accumulation,
    # f32 elementwise math (bias add + LeakyReLU).
    xb = x_ref[...].astype(jnp.bfloat16)                          # (TB, D)
    h1 = jnp.dot(xb, w1_ref[...], preferred_element_type=jnp.float32)
    h1 = h1 + b1_ref[...]                                         # (TB, 512) f32
    h1 = jnp.where(h1 > 0, h1, 0.2 * h1)

    # ---- Layer 2: Linear(512, 256) + LeakyReLU(0.2) ------------------------
    h2 = jnp.dot(h1.astype(jnp.bfloat16), w2_ref[...],
                 preferred_element_type=jnp.float32)
    h2 = h2 + b2_ref[...]                                         # (TB, 256) f32
    h2 = jnp.where(h2 > 0, h2, 0.2 * h2)

    # ---- Layer 3: Linear(256, 1) as a VPU/XLU reduction ---------------------
    # w3 is stored as a (1, 256) row; avoids a near-0%-utilization N=1 MXU
    # matmul and the lane-sparse result drain.
    val = jnp.sum(h2 * w3_ref[...], axis=-1, keepdims=True)       # (TB, 1) f32
    val = val + b3_ref[0, 0]                                      # scalar bias (SMEM)

    # Lane-dense store: broadcast across 128 lanes (unmasked vst); the wrapper
    # slices column 0 back out.
    out_ref[...] = jnp.broadcast_to(val, out_ref.shape)


def discriminator_forward(img, params):
    """img: (B, C, H, W) float32 NCHW. Returns validity (B, 1) float32."""
    w1, b1, w2, b2, w3_row, b3 = params
    B = img.shape[0]
    D = math.prod(img.shape[1:])
    x = img.reshape(B, D)                         # torch .view(B, -1)

    # Batch tiling: fill the MXU M dimension (up to 128 rows per step); pad B
    # to a multiple of the tile. Padded rows are sliced off after the kernel.
    TB = min(128, _round_up(B, 8))
    Bp = _round_up(B, TB)
    if Bp != B:
        x = jnp.pad(x, ((0, Bp - B), (0, 0)))

    # bf16 weights for the two MXU matmuls: 2x MXU rate on v6e/v7x and half
    # the weight-resident VMEM (matters on v7x's 64 MiB VMEM).
    w1_bf = w1.astype(jnp.bfloat16)
    w2_bf = w2.astype(jnp.bfloat16)

    out = pl.pallas_call(
        discriminator_kernel,
        out_shape=jax.ShapeDtypeStruct((Bp, 128), jnp.float32),
        grid=(Bp // TB,),
        in_specs=[
            pl.BlockSpec((TB, D), lambda i: (i, 0)),        # x: tiled along B
            pl.BlockSpec(w1_bf.shape, lambda i: (0, 0)),    # weights/biases:
            pl.BlockSpec(b1.shape, lambda i: (0, 0)),       #   constant index ->
            pl.BlockSpec(w2_bf.shape, lambda i: (0, 0)),    #   VMEM-resident
            pl.BlockSpec(b2.shape, lambda i: (0, 0)),       #   across grid steps
            pl.BlockSpec(w3_row.shape, lambda i: (0, 0)),   # (1, 256) row
            pl.BlockSpec(memory_space=pltpu.MemorySpace.SMEM),  # b3 scalar
        ],
        out_specs=pl.BlockSpec((TB, 128), lambda i: (i, 0)),
        compiler_params=pltpu.CompilerParams(
            dimension_semantics=("parallel",)),
    )(x, w1_bf, b1, w2_bf, b2, w3_row, b3)

    return out[:B, :1]


def init_params(key, in_dim):
    """Synthetic weights matching nn.Linear shapes, stored transposed (in, out).

    Layer-3 weight is kept as a (1, 256) row (for the in-kernel reduction)
    and its bias as a (1, 1) scalar (for SMEM).
    """
    def linear(k, din, dout):
        kw, kb = jax.random.split(k)
        bound = 1.0 / (din ** 0.5)  # torch default init range
        w = jax.random.uniform(kw, (din, dout), jnp.float32, -bound, bound)
        b = jax.random.uniform(kb, (1, dout), jnp.float32, -bound, bound)
        return w, b

    k1, k2, k3 = jax.random.split(key, 3)
    w1, b1 = linear(k1, in_dim, 512)
    w2, b2 = linear(k2, 512, 256)
    w3, b3 = linear(k3, 256, 1)
    return (w1, b1, w2, b2, w3.T, b3.reshape(1, 1))


def reference_forward(img, params):
    """Pure-JAX reference with the same bf16-operand / f32-accumulate math."""
    w1, b1, w2, b2, w3_row, b3 = params
    x = img.reshape(img.shape[0], -1)
    h1 = jnp.dot(x.astype(jnp.bfloat16), w1.astype(jnp.bfloat16),
                 preferred_element_type=jnp.float32) + b1
    h1 = jnp.where(h1 > 0, h1, 0.2 * h1)
    h2 = jnp.dot(h1.astype(jnp.bfloat16), w2.astype(jnp.bfloat16),
                 preferred_element_type=jnp.float32) + b2
    h2 = jnp.where(h2 > 0, h2, 0.2 * h2)
    return jnp.sum(h2 * w3_row, axis=-1, keepdims=True) + b3[0, 0]


if __name__ == "__main__":
    key = jax.random.PRNGKey(0)
    k_img, k_par = jax.random.split(key)

    # Small shapes consistent with the module: img_shape = (C, H, W)
    B, C, H, W = 8, 1, 16, 16
    img = jax.random.normal(k_img, (B, C, H, W), jnp.float32)

    params = init_params(k_par, C * H * W)

    validity = discriminator_forward(img, params)
    validity = jax.block_until_ready(validity)

    ref = reference_forward(img, params)
    assert validity.shape == (B, 1), validity.shape
    assert jnp.allclose(validity, ref, atol=5e-3, rtol=5e-3), (
        "mismatch vs reference: max abs err = "
        f"{jnp.max(jnp.abs(validity - ref))}")

    print("KERNEL_OK")
</pallas_src>

<mosaic_0001>
module attributes {stable_mosaic.version = 11 : i64} {
  func.func @discriminator_kernel(%arg0: i32, %arg1: memref<8x256xf32, #tpu.memory_space<vmem>>, %arg2: memref<256x512xbf16, #tpu.memory_space<vmem>>, %arg3: memref<1x512xf32, #tpu.memory_space<vmem>>, %arg4: memref<512x256xbf16, #tpu.memory_space<vmem>>, %arg5: memref<1x256xf32, #tpu.memory_space<vmem>>, %arg6: memref<1x256xf32, #tpu.memory_space<vmem>>, %arg7: memref<1x1xf32, #tpu.memory_space<smem>>, %arg8: memref<8x128xf32, #tpu.memory_space<vmem>>) attributes {dimension_semantics = [#tpu.dimension_semantics<parallel>], iteration_bounds = array<i64: 1>, scalar_prefetch = 0 : i64, scratch_operands = 0 : i64, tpu.core_type = #tpu.core_type<tc>, window_params = [{transform_indices = @transform_0, window_bounds = array<i64: 8, 256>}, {pipeline_mode = #tpu.pipeline_mode<synchronous>, transform_indices = @transform_1, window_bounds = array<i64: 256, 512>}, {pipeline_mode = #tpu.pipeline_mode<synchronous>, transform_indices = @transform_2, window_bounds = array<i64: 1, 512>}, {pipeline_mode = #tpu.pipeline_mode<synchronous>, transform_indices = @transform_3, window_bounds = array<i64: 512, 256>}, {pipeline_mode = #tpu.pipeline_mode<synchronous>, transform_indices = @transform_4, window_bounds = array<i64: 1, 256>}, {pipeline_mode = #tpu.pipeline_mode<synchronous>, transform_indices = @transform_5, window_bounds = array<i64: 1, 256>}, {transform_indices = @transform_6, window_bounds = array<i64: 1, 1>}, {transform_indices = @transform_7, window_bounds = array<i64: 8, 128>}]} {
    %c0 = arith.constant 0 : index
    %c0_0 = arith.constant 0 : index
    %0 = vector.load %arg1[%c0, %c0_0] : memref<8x256xf32, #tpu.memory_space<vmem>>, vector<8x256xf32>
    %1 = arith.truncf %0 : vector<8x256xf32> to vector<8x256xbf16>
    %c0_1 = arith.constant 0 : index
    %c0_2 = arith.constant 0 : index
    %2 = vector.load %arg2[%c0_1, %c0_2] : memref<256x512xbf16, #tpu.memory_space<vmem>>, vector<256x512xbf16>
    %cst = arith.constant dense<0.000000e+00> : vector<8x512xf32>
    %3 = tpu.matmul %1, %2, %cst {dimension_numbers = #tpu.dot_dimension_numbers<[1], [0], [0], [1], [0, 0, 1, 1], [], []>} : vector<8x256xbf16>, vector<256x512xbf16>, vector<8x512xf32> -> vector<8x512xf32>
    %c0_3 = arith.constant 0 : index
    %c0_4 = arith.constant 0 : index
    %4 = vector.load %arg3[%c0_3, %c0_4] : memref<1x512xf32, #tpu.memory_space<vmem>>, vector<1x512xf32>
    %5 = vector.broadcast %4 : vector<1x512xf32> to vector<8x512xf32>
    %6 = arith.addf %3, %5 : vector<8x512xf32>
    %cst_5 = arith.constant 0.000000e+00 : f32
    %7 = vector.broadcast %cst_5 : f32 to vector<8x512xf32>
    %8 = arith.cmpf ogt, %6, %7 : vector<8x512xf32>
    %cst_6 = arith.constant 2.000000e-01 : f32
    %9 = vector.broadcast %cst_6 : f32 to vector<8x512xf32>
    %10 = arith.mulf %9, %6 : vector<8x512xf32>
    %11 = arith.select %8, %6, %10 : vector<8x512xi1>, vector<8x512xf32>
    %12 = arith.truncf %11 : vector<8x512xf32> to vector<8x512xbf16>
    %c0_7 = arith.constant 0 : index
    %c0_8 = arith.constant 0 : index
    %13 = vector.load %arg4[%c0_7, %c0_8] : memref<512x256xbf16, #tpu.memory_space<vmem>>, vector<512x256xbf16>
    %cst_9 = arith.constant dense<0.000000e+00> : vector<8x256xf32>
    %14 = tpu.matmul %12, %13, %cst_9 {dimension_numbers = #tpu.dot_dimension_numbers<[1], [0], [0], [1], [0, 0, 1, 1], [], []>} : vector<8x512xbf16>, vector<512x256xbf16>, vector<8x256xf32> -> vector<8x256xf32>
    %c0_10 = arith.constant 0 : index
    %c0_11 = arith.constant 0 : index
    %15 = vector.load %arg5[%c0_10, %c0_11] : memref<1x256xf32, #tpu.memory_space<vmem>>, vector<1x256xf32>
    %16 = vector.broadcast %15 : vector<1x256xf32> to vector<8x256xf32>
    %17 = arith.addf %14, %16 : vector<8x256xf32>
    %cst_12 = arith.constant 0.000000e+00 : f32
    %18 = vector.broadcast %cst_12 : f32 to vector<8x256xf32>
    %19 = arith.cmpf ogt, %17, %18 : vector<8x256xf32>
    %cst_13 = arith.constant 2.000000e-01 : f32
    %20 = vector.broadcast %cst_13 : f32 to vector<8x256xf32>
    %21 = arith.mulf %20, %17 : vector<8x256xf32>
    %22 = arith.select %19, %17, %21 : vector<8x256xi1>, vector<8x256xf32>
    %c0_14 = arith.constant 0 : index
    %c0_15 = arith.constant 0 : index
    %23 = vector.load %arg6[%c0_14, %c0_15] : memref<1x256xf32, #tpu.memory_space<vmem>>, vector<1x256xf32>
    %24 = vector.broadcast %23 : vector<1x256xf32> to vector<8x256xf32>
    %25 = arith.mulf %22, %24 : vector<8x256xf32>
    %cst_16 = arith.constant dense<0.000000e+00> : vector<8xf32>
    %26 = vector.multi_reduction <add>, %25, %cst_16 [1] : vector<8x256xf32> to vector<8xf32>
    %27 = vector.shape_cast %26 : vector<8xf32> to vector<8x1xf32>
    %c0_17 = arith.constant 0 : index
    %c0_18 = arith.constant 0 : index
    %28 = memref.load %arg7[%c0_17, %c0_18] : memref<1x1xf32, #tpu.memory_space<smem>>
    %29 = vector.broadcast %28 : f32 to vector<8x1xf32>
    %30 = arith.addf %27, %29 : vector<8x1xf32>
    %31 = vector.shape_cast %30 : vector<8x1xf32> to vector<8x1xf32>
    %32 = vector.broadcast %31 : vector<8x1xf32> to vector<8x128xf32>
    %c0_19 = arith.constant 0 : index
    %c0_20 = arith.constant 0 : index
    %33 = vector.load %arg8[%c0_19, %c0_20] : memref<8x128xf32, #tpu.memory_space<vmem>>, vector<8x128xf32>
    tpu.vector_store %arg8[%c0_19, %c0_20], %32 {strides = array<i32>} : memref<8x128xf32, #tpu.memory_space<vmem>>, vector<8x128xf32>,
    return
  }
  func.func @transform_0(%arg0: i32) -> (i32, i32) {
    %c0_i32 = arith.constant 0 : i32
    %c0_i32_0 = arith.constant 0 : i32
    return %arg0, %c0_i32 : i32, i32
  }
  func.func @transform_1(%arg0: i32) -> (i32, i32) {
    %c0_i32 = arith.constant 0 : i32
    %c0_i32_0 = arith.constant 0 : i32
    %c0_i32_1 = arith.constant 0 : i32
    return %c0_i32, %c0_i32_0 : i32, i32
  }
  func.func @transform_2(%arg0: i32) -> (i32, i32) {
    %c0_i32 = arith.constant 0 : i32
    %c0_i32_0 = arith.constant 0 : i32
    %c0_i32_1 = arith.constant 0 : i32
    return %c0_i32, %c0_i32_0 : i32, i32
  }
  func.func @transform_3(%arg0: i32) -> (i32, i32) {
    %c0_i32 = arith.constant 0 : i32
    %c0_i32_0 = arith.constant 0 : i32
    %c0_i32_1 = arith.constant 0 : i32
    return %c0_i32, %c0_i32_0 : i32, i32
  }
  func.func @transform_4(%arg0: i32) -> (i32, i32) {
    %c0_i32 = arith.constant 0 : i32
    %c0_i32_0 = arith.constant 0 : i32
    %c0_i32_1 = arith.constant 0 : i32
    return %c0_i32, %c0_i32_0 : i32, i32
  }
  func.func @transform_5(%arg0: i32) -> (i32, i32) {
    %c0_i32 = arith.constant 0 : i32
    %c0_i32_0 = arith.constant 0 : i32
    %c0_i32_1 = arith.constant 0 : i32
    return %c0_i32, %c0_i32_0 : i32, i32
  }
  func.func @transform_6(%arg0: i32) -> (i32, i32) {
    %c0_i32 = arith.constant 0 : i32
    %c0_i32_0 = arith.constant 0 : i32
    %c0_i32_1 = arith.constant 0 : i32
    return %c0_i32, %c0_i32_0 : i32, i32
  }
  func.func @transform_7(%arg0: i32) -> (i32, i32) {
    %c0_i32 = arith.constant 0 : i32
    %c0_i32_0 = arith.constant 0 : i32
    return %arg0, %c0_i32 : i32, i32
  }
}

</mosaic_0001>

<bundles_post_ra>
// kernel: tpu_custom_call.1
= control target key start
LH: loop header
LB: loop body
LE: loop exit
PB: predicated region body
PF: predicated region fallthrough
CT: control target
= control target key end

     0   :  { %13 = vsyncpa [#allocation4], 0  ;;  %s1662_s0 = inlined_call_operand.hbm [shape: f32[8,256], index: 0, kind: input, shape index: {}]   ;;  %s1663_s1 = inlined_call_operand.hbm [shape: bf16[256,512], index: 1, kind: input, shape index: {}]   ;;  %s1664_s2 = inlined_call_operand.vmem [shape: f32[1,512], index: 2, kind: input, shape index: {}]   ;;  %s1665_s3 = inlined_call_operand.hbm [shape: bf16[512,256], index: 3, kind: input, shape index: {}]   ;;  %s1666_s4 = inlined_call_operand.vmem [shape: f32[1,256], index: 4, kind: input, shape index: {}]   ;;  %s1667_s5 = inlined_call_operand.vmem [shape: f32[1,256], index: 5, kind: input, shape index: {}]   ;;  %s1668_s6 = inlined_call_operand.<no memory space> [shape: f32[1,1], index: 6, kind: input, shape index: {}]   ;;  %s1669_s7 = inlined_call_operand.hbm [shape: f32[8,128], index: 7, kind: output, shape index: {}]  }
   0x1   :  { %14 = vsyncpa [#allocation7], 0 }
   0x2   :  { %15 = vsyncpa [#allocation5], 0  ;;  %s1524_s24 = smov [#allocation6]   ;;  %s1430_s28 = scalar_lea.hbm %s1663_s1, 8192 }
   0x3   :  { %s31_s25 = sshll.u32 %s1524_s24, 4  ;;  %p1431_p0 = scmp.ne.s32.totalorder %s1663_s1, %s1430_s28  ;;  %s32_s25 = int_to_ptr.vmem [resolvable:$true] %s31_s25 }
   0x4   :  { %p1434_p1 = scmp.lt.u32.totalorder %s1430_s28, %s1663_s1 }
   0x6   :  { %p1436_p2 = pnand %p1434_p1, %p1431_p0 }
   0x8   :  { %1439 = shalt.err (!%p1436_p2)
}
   0x9   :  { %s1440_s10 = scalar_lea.vmem %s32_s25, 8192  ;;  %p1445_p4 = scmp.lt.s32.totalorder %s32_s25, %s32_s25 }
   0xa   :  { %p1441_p3 = scmp.ne.s32.totalorder %s32_s25, %s1440_s10  ;;  %p1446_p5 = scmp.lt.s32.totalorder %s1440_s10, %s1440_s10 }
   0xc   :  { %p1447_p6 = por %p1446_p5, %p1445_p4 }
   0xe   :  { %p1448_p7 = pnand %p1447_p6, %p1441_p3 }
  0x10   :  { %1451 = shalt.err (!%p1448_p7)
}
  0x11   :  { %s1525_s11 = smov 256   ;;  %s1526_s12 = smov 16  }
  0x12   :  { %37 = dma.hbm_to_vmem [thread:$0]  %s1663_s1, 8192, %s32_s25, [#allocation7], %s1525_s11, %s1525_s11, %s1526_s12  }
  0x13   :  { %s1527_s15 = smov [#allocation3]   ;;  %s1528_s17 = smov [#allocation8]  }
  0x14   :  { %s22_s16 = sshll.u32 %s1527_s15, 4  ;;  %s45_s18 = sshll.u32 %s1528_s17, 4  ;;  %s23_s16 = int_to_ptr.vmem [resolvable:$true] %s22_s16  ;;  %s46_s18 = int_to_ptr.vmem [resolvable:$true] %s45_s18 }
  0x15   :  { %s1452_s21 = scalar_lea.hbm %s1662_s0, 256 }
  0x16   :  { %p1453_p8 = scmp.ne.s32.totalorder %s1662_s0, %s1452_s21  ;;  %p1456_p9 = scmp.lt.u32.totalorder %s1452_s21, %s1662_s0 }
  0x18   :  { %p1458_p10 = pnand %p1456_p9, %p1453_p8 }
  0x1a   :  { %1461 = shalt.err (!%p1458_p10)
}
  0x1b   :  { %s1462_s1 = scalar_lea.vmem %s23_s16, 256  ;;  %p1467_p12 = scmp.lt.s32.totalorder %s23_s16, %s23_s16 }
  0x1c   :  { %p1463_p11 = scmp.ne.s32.totalorder %s23_s16, %s1462_s1  ;;  %p1468_p13 = scmp.lt.s32.totalorder %s1462_s1, %s1462_s1 }
  0x1e   :  { %p1469_p0 = por %p1468_p13, %p1467_p12 }
  0x20   :  { %p1470_p1 = pnand %p1469_p0, %p1463_p11 }
  0x22   :  { %1473 = shalt.err (!%p1470_p1)
}
  0x23   :  { %25 = dma.hbm_to_vmem [thread:$0]  %s1662_s0, 256, %s23_s16, [#allocation4]  }
  0x24   :  { %s1474_s30 = scalar_lea.hbm %s1665_s3, 8192 }
  0x25   :  { %p1475_p2 = scmp.ne.s32.totalorder %s1665_s3, %s1474_s30  ;;  %p1478_p3 = scmp.lt.u32.totalorder %s1474_s30, %s1665_s3 }
  0x27   :  { %p1480_p4 = pnand %p1478_p3, %p1475_p2 }
  0x29   :  { %1483 = shalt.err (!%p1480_p4)
}
  0x2a   :  { %s1484_s12 = scalar_lea.vmem %s46_s18, 8192  ;;  %p1489_p6 = scmp.lt.s32.totalorder %s46_s18, %s46_s18 }
  0x2b   :  { %p1485_p5 = scmp.ne.s32.totalorder %s46_s18, %s1484_s12  ;;  %p1490_p7 = scmp.lt.s32.totalorder %s1484_s12, %s1484_s12 }
  0x2d   :  { %p1491_p8 = por %p1490_p7, %p1489_p6 }
  0x2f   :  { %p1492_p9 = pnand %p1491_p8, %p1485_p5 }
  0x31   :  { %1495 = shalt.err (!%p1492_p9)
}
  0x32   :  { %s1529_s0 = smov 128   ;;  %s1530_s13 = smov 8  }
  0x33   :  { %51 = dma.hbm_to_vmem [thread:$0]  %s1665_s3, 8192, %s46_s18, [#allocation7], %s1529_s0, %s1529_s0, %s1530_s13  }
  0x34   :  { %1518 = dma.done.wait [#allocation4], 256  }
  0x35   :  { %1519 = vsyncadd [#allocation4], 4294967040 }
  0x36   :  { %1520 = dma.done.wait [#allocation7], 16384  }
  0x37   :  { %1521 = vsyncadd [#allocation7], 4294950912  ;;  %v1238_v0 = vld [vmem:[#allocation6 + $0x4] ss:$16 sps:$4 sm:$0xff]   ;;  %v1240_v1 = vld [vmem:[#allocation6] ss:$16 sps:$4 sm:$0xff]  }
  0x38   :  { %477 = vmatprep.subr.bf16.mxu1 %v1238_v0  ;;  %v1241_v2 = vld [vmem:[#allocation6 + $0x24] ss:$16 sps:$4 sm:$0xff]   ;;  %v1243_v3 = vld [vmem:[#allocation6 + $0x20] ss:$16 sps:$4 sm:$0xff]   ;;  %v68_v13 = vld [vmem:[#allocation3 + $0x8] sm:$0xff]  ;;  %s1531_s20 = smov [#allocation9]  }
  0x39   :  { %478 = vmatpush1.bf16.msra.mxu1 %v1240_v1  ;;  %v1244_v4 = vld [vmem:[#allocation6 + $0x44] ss:$16 sps:$4 sm:$0xff]   ;;  %v1246_v5 = vld [vmem:[#allocation6 + $0x40] ss:$16 sps:$4 sm:$0xff]   ;;  %v1608_v14 = vpack.c.bf16 %v68_v13, %v68_v13  ;;  %v1288_v45 = vld [vmem:[#allocation6 + $0xc] ss:$16 sps:$4 sm:$0xff]  }
  0x3a   :  { %479 = vmatprep.subr.bf16.mxu1 %v1241_v2  ;;  %v1247_v6 = vld [vmem:[#allocation6 + $0x64] ss:$16 sps:$4 sm:$0xff]   ;;  %v1249_v7 = vld [vmem:[#allocation6 + $0x60] ss:$16 sps:$4 sm:$0xff]   ;;  %v1286_v47 = vld [vmem:[#allocation6 + $0x8] ss:$16 sps:$4 sm:$0xff]  }
  0x3b   :  { %v1250_v8 = vld [vmem:[#allocation6 + $0x84] ss:$16 sps:$4 sm:$0xff]   ;;  %v1252_v9 = vld [vmem:[#allocation6 + $0x80] ss:$16 sps:$4 sm:$0xff]   ;;  %509 = vmatprep.mubr.bf16.mxu1 %v1608_v14  ;;  %v1291_v49 = vld [vmem:[#allocation6 + $0x2c] ss:$16 sps:$4 sm:$0xff]  }
  0x3c   :  { %v1253_v10 = vld [vmem:[#allocation6 + $0xa4] ss:$16 sps:$4 sm:$0xff]   ;;  %v1255_v11 = vld [vmem:[#allocation6 + $0xa0] ss:$16 sps:$4 sm:$0xff]   ;;  %v1289_v52 = vld [vmem:[#allocation6 + $0x28] ss:$16 sps:$4 sm:$0xff]  }
  0x3d   :  { %480 = vmatpush1.bf16.msra.mxu1 %v1243_v3  ;;  %v1256_v12 = vld [vmem:[#allocation6 + $0xc4] ss:$16 sps:$4 sm:$0xff]   ;;  %v1258_v15 = vld [vmem:[#allocation6 + $0xc0] ss:$16 sps:$4 sm:$0xff]   ;;  %v1294_v53 = vld [vmem:[#allocation6 + $0x4c] ss:$16 sps:$4 sm:$0xff]  }
  0x3e   :  { %481 = vmatprep.subr.bf16.mxu1 %v1244_v4  ;;  %v1259_v16 = vld [vmem:[#allocation6 + $0xe4] ss:$16 sps:$4 sm:$0xff]   ;;  %v1261_v17 = vld [vmem:[#allocation6 + $0xe0] ss:$16 sps:$4 sm:$0xff]   ;;  %v1292_v56 = vld [vmem:[#allocation6 + $0x48] ss:$16 sps:$4 sm:$0xff]  }
  0x3f   :  { %v1262_v18 = vld [vmem:[#allocation6 + $0x104] ss:$16 sps:$4 sm:$0xff]   ;;  %v1264_v19 = vld [vmem:[#allocation6 + $0x100] ss:$16 sps:$4 sm:$0xff]   ;;  %v1297_v57 = vld [vmem:[#allocation6 + $0x6c] ss:$16 sps:$4 sm:$0xff]  }
  0x40   :  { %v1265_v20 = vld [vmem:[#allocation6 + $0x124] ss:$16 sps:$4 sm:$0xff]   ;;  %v1267_v21 = vld [vmem:[#allocation6 + $0x120] ss:$16 sps:$4 sm:$0xff]   ;;  %v1295_v60 = vld [vmem:[#allocation6 + $0x68] ss:$16 sps:$4 sm:$0xff]  }
  0x41   :  { %482 = vmatpush1.bf16.msra.mxu1 %v1246_v5  ;;  %v1268_v22 = vld [vmem:[#allocation6 + $0x144] ss:$16 sps:$4 sm:$0xff]   ;;  %v1270_v23 = vld [vmem:[#allocation6 + $0x140] ss:$16 sps:$4 sm:$0xff]   ;;  %v1300_v61 = vld [vmem:[#allocation6 + $0x8c] ss:$16 sps:$4 sm:$0xff]  }
  0x42   :  { %483 = vmatprep.subr.bf16.mxu1 %v1247_v6  ;;  %v1271_v24 = vld [vmem:[#allocation6 + $0x164] ss:$16 sps:$4 sm:$0xff]   ;;  %v1273_v25 = vld [vmem:[#allocation6 + $0x160] ss:$16 sps:$4 sm:$0xff]   ;;  %v1298_v0 = vld [vmem:[#allocation6 + $0x88] ss:$16 sps:$4 sm:$0xff]  }
  0x43   :  { %v1274_v26 = vld [vmem:[#allocation6 + $0x184] ss:$16 sps:$4 sm:$0xff]   ;;  %v1336_v28 = vld [vmem:[#allocation8] ss:$8 sps:$4 sm:$0xff]   ;;  %v1339_v31 = vld [vmem:[#allocation8 + $0x10] ss:$8 sps:$4 sm:$0xff]  }
  0x44   :  { %v1334_v27 = vld [vmem:[#allocation8 + $0x4] ss:$8 sps:$4 sm:$0xff]   ;;  %v1337_v29 = vld [vmem:[#allocation8 + $0x14] ss:$8 sps:$4 sm:$0xff]   ;;  %v1276_v30 = vld [vmem:[#allocation6 + $0x180] ss:$16 sps:$4 sm:$0xff]  }
  0x45   :  { %484 = vmatpush1.bf16.msra.mxu1 %v1249_v7  ;;  %971 = vmatprep.subr.bf16.mxu0 %v1334_v27  ;;  %v1277_v32 = vld [vmem:[#allocation6 + $0x1a4] ss:$16 sps:$4 sm:$0xff]   ;;  %v1279_v34 = vld [vmem:[#allocation6 + $0x1a0] ss:$16 sps:$4 sm:$0xff]   ;;  %v1303_v1 = vld [vmem:[#allocation6 + $0xac] ss:$16 sps:$4 sm:$0xff]  }
  0x46   :  { %485 = vmatprep.subr.bf16.mxu1 %v1250_v8  ;;  %972 = vmatpush1.bf16.msra.mxu0 %v1336_v28  ;;  %v1340_v33 = vld [vmem:[#allocation8 + $0x24] ss:$8 sps:$4 sm:$0xff]   ;;  %v1342_v35 = vld [vmem:[#allocation8 + $0x20] ss:$8 sps:$4 sm:$0xff]   ;;  %v1343_v37 = vld [vmem:[#allocation8 + $0x34] ss:$8 sps:$4 sm:$0xff]  }
  0x47   :  { %973 = vmatprep.subr.bf16.mxu0 %v1337_v29  ;;  %v1280_v36 = vld [vmem:[#allocation6 + $0x1c4] ss:$16 sps:$4 sm:$0xff]   ;;  %v1282_v38 = vld [vmem:[#allocation6 + $0x1c0] ss:$16 sps:$4 sm:$0xff]   ;;  %v1301_v4 = vld [vmem:[#allocation6 + $0xa8] ss:$16 sps:$4 sm:$0xff]  }
  0x48   :  { %v1345_v39 = vld [vmem:[#allocation8 + $0x30] ss:$8 sps:$4 sm:$0xff]   ;;  %v1283_v40 = vld [vmem:[#allocation6 + $0x1e4] ss:$16 sps:$4 sm:$0xff]   ;;  %v1348_v44 = vld [vmem:[#allocation8 + $0x40] ss:$8 sps:$4 sm:$0xff]  }
  0x49   :  { %486 = vmatpush1.bf16.msra.mxu1 %v1252_v9  ;;  %v1346_v41 = vld [vmem:[#allocation8 + $0x44] ss:$8 sps:$4 sm:$0xff]   ;;  %v1285_v42 = vld [vmem:[#allocation6 + $0x1e0] ss:$16 sps:$4 sm:$0xff]   ;;  %v1349_v46 = vld [vmem:[#allocation8 + $0x54] ss:$8 sps:$4 sm:$0xff]  }
  0x4a   :  { %487 = vmatprep.subr.bf16.mxu1 %v1253_v10  ;;  %974 = vmatpush1.bf16.msra.mxu0 %v1339_v31  ;;  %v67_v43 = vld [vmem:[#allocation3] sm:$0xff]  ;;  %v1352_v51 = vld [vmem:[#allocation8 + $0x64] ss:$8 sps:$4 sm:$0xff]   ;;  %v1354_v54 = vld [vmem:[#allocation8 + $0x60] ss:$8 sps:$4 sm:$0xff]   ;;  %s1086_s21 = sshll.u32 %s1531_s20, 4  ;;  %s1087_s21 = int_to_ptr.vmem [resolvable:$true] %s1086_s21 }
  0x4b   :  { %975 = vmatprep.subr.bf16.mxu0 %v1340_v33  ;;  %v1611_v48 = vpack.c.bf16 %v67_v43, %v67_v43  ;;  %v1351_v50 = vld [vmem:[#allocation8 + $0x50] ss:$8 sps:$4 sm:$0xff]   ;;  %v1355_v55 = vld [vmem:[#allocation8 + $0x74] ss:$8 sps:$4 sm:$0xff]   ;;  %v1358_v59 = vld [vmem:[#allocation8 + $0x84] ss:$8 sps:$4 sm:$0xff]   ;;  %p1501_p11 = scmp.lt.s32.totalorder %s1087_s21, %s1087_s21 }
  0x4c   :  { %v1357_v58 = vld [vmem:[#allocation8 + $0x70] ss:$8 sps:$4 sm:$0xff]   ;;  %v1360_v62 = vld [vmem:[#allocation8 + $0x80] ss:$8 sps:$4 sm:$0xff]   ;;  %v1361_v63 = vld [vmem:[#allocation8 + $0x94] ss:$8 sps:$4 sm:$0xff]  }
  0x4d   :  { %488 = vmatpush1.bf16.msra.mxu1 %v1255_v11  ;;  %v1363_v2 = vld [vmem:[#allocation8 + $0x90] ss:$8 sps:$4 sm:$0xff]   ;;  %v1364_v3 = vld [vmem:[#allocation8 + $0xa4] ss:$8 sps:$4 sm:$0xff]   ;;  %v1366_v6 = vld [vmem:[#allocation8 + $0xa0] ss:$8 sps:$4 sm:$0xff]  }
  0x4e   :  { %489 = vmatprep.subr.bf16.mxu1 %v1256_v12  ;;  %976 = vmatpush1.bf16.msra.mxu0 %v1342_v35  ;;  %v1306_v5 = vld [vmem:[#allocation6 + $0xcc] ss:$16 sps:$4 sm:$0xff]   ;;  %v1304_v8 = vld [vmem:[#allocation6 + $0xc8] ss:$16 sps:$4 sm:$0xff]   ;;  %s1496_s22 = scalar_lea.vmem %s1087_s21, 128 }
  0x4f   :  { %977 = vmatprep.subr.bf16.mxu0 %v1343_v37  ;;  %v1367_v7 = vld [vmem:[#allocation8 + $0xb4] ss:$8 sps:$4 sm:$0xff]   ;;  %v1369_v10 = vld [vmem:[#allocation8 + $0xb0] ss:$8 sps:$4 sm:$0xff]   ;;  %v1370_v11 = vld [vmem:[#allocation8 + $0xc4] ss:$8 sps:$4 sm:$0xff]   ;;  %v137_v37 = vlaneseq  ;;  %p1497_p10 = scmp.ne.s32.totalorder %s1087_s21, %s1496_s22  ;;  %p1502_p12 = scmp.lt.s32.totalorder %s1496_s22, %s1496_s22 }
  0x50   :  { %v1309_v9 = vld [vmem:[#allocation6 + $0xec] ss:$16 sps:$4 sm:$0xff]   ;;  %v1307_v12 = vld [vmem:[#allocation6 + $0xe8] ss:$16 sps:$4 sm:$0xff]  }
  0x51   :  { %490 = vmatpush1.bf16.msra.mxu1 %v1258_v15  ;;  %v1312_v13 = vld [vmem:[#allocation6 + $0x10c] ss:$16 sps:$4 sm:$0xff]   ;;  %v1325_v27 = vld [vmem:[#allocation6 + $0x1a8] ss:$16 sps:$4 sm:$0xff]   ;;  %p1503_p13 = por %p1502_p12, %p1501_p11 }
  0x52   :  { %491 = vmatprep.subr.bf16.mxu1 %v1259_v16  ;;  %978 = vmatpush1.bf16.msra.mxu0 %v1345_v39  ;;  %v1373_v15 = vld [vmem:[#allocation8 + $0xd4] ss:$8 sps:$4 sm:$0xff]   ;;  %v1310_v16 = vld [vmem:[#allocation6 + $0x108] ss:$16 sps:$4 sm:$0xff]  }
  0x53   :  { %979 = vmatprep.subr.bf16.mxu0 %v1346_v41  ;;  %v1330_v28 = vld [vmem:[#allocation6 + $0x1cc] ss:$16 sps:$4 sm:$0xff]   ;;  %v1328_v29 = vld [vmem:[#allocation6 + $0x1c8] ss:$16 sps:$4 sm:$0xff]   ;;  %p1504_p0 = pnand %p1503_p13, %p1497_p10 }
  0x54   :  { %v1331_v31 = vld [vmem:[#allocation6 + $0x1e8] ss:$16 sps:$4 sm:$0xff]  }
  0x55   :  { %492 = vmatpush1.bf16.msra.mxu1 %v1261_v17  ;;  %v1315_v17 = vld [vmem:[#allocation6 + $0x12c] ss:$16 sps:$4 sm:$0xff]   ;;  %v1378_v33 = vld [vmem:[#allocation8 + $0xe0] ss:$8 sps:$4 sm:$0xff]   ;;  %v1381_v35 = vld [vmem:[#allocation8 + $0xf0] ss:$8 sps:$4 sm:$0xff]  }
  0x56   :  { %493 = vmatprep.subr.bf16.mxu1 %v1262_v18  ;;  %980 = vmatpush1.bf16.msra.mxu0 %v1348_v44  ;;  %v1375_v18 = vld [vmem:[#allocation8 + $0xd0] ss:$8 sps:$4 sm:$0xff]  }
  0x57   :  { %981 = vmatprep.subr.bf16.mxu0 %v1349_v46 }
  0x59   :  { %494 = vmatpush1.bf16.msra.mxu1 %v1264_v19  ;;  %v1313_v19 = vld [vmem:[#allocation6 + $0x128] ss:$16 sps:$4 sm:$0xff]  }
  0x5a   :  { %495 = vmatprep.subr.bf16.mxu1 %v1265_v20  ;;  %982 = vmatpush1.bf16.msra.mxu0 %v1351_v50  ;;  %v1318_v20 = vld [vmem:[#allocation6 + $0x14c] ss:$16 sps:$4 sm:$0xff]  }
  0x5b   :  { %983 = vmatprep.subr.bf16.mxu0 %v1352_v51 }
  0x5d   :  { %496 = vmatpush1.bf16.msra.mxu1 %v1267_v21  ;;  %v1316_v21 = vld [vmem:[#allocation6 + $0x148] ss:$16 sps:$4 sm:$0xff]  }
  0x5e   :  { %497 = vmatprep.subr.bf16.mxu1 %v1268_v22  ;;  %984 = vmatpush1.bf16.msra.mxu0 %v1354_v54  ;;  %v1321_v22 = vld [vmem:[#allocation6 + $0x16c] ss:$16 sps:$4 sm:$0xff]  }
  0x5f   :  { %985 = vmatprep.subr.bf16.mxu0 %v1355_v55  ;;  %v1382_v55 = vld [vmem:[#allocation8 + $0x100] ss:$8 sps:$4 sm:$0xff]  }
  0x61   :  { %498 = vmatpush1.bf16.msra.mxu1 %v1270_v23  ;;  %v1319_v23 = vld [vmem:[#allocation6 + $0x168] ss:$16 sps:$4 sm:$0xff]  }
  0x62   :  { %499 = vmatprep.subr.bf16.mxu1 %v1271_v24  ;;  %986 = vmatpush1.bf16.msra.mxu0 %v1357_v58  ;;  %v1324_v24 = vld [vmem:[#allocation6 + $0x18c] ss:$16 sps:$4 sm:$0xff]   ;;  %v1385_v58 = vld [vmem:[#allocation8 + $0x110] ss:$8 sps:$4 sm:$0xff]  }
  0x63   :  { %987 = vmatprep.subr.bf16.mxu0 %v1358_v59  ;;  %v1390_v59 = vld [vmem:[#allocation8 + $0x124] ss:$8 sps:$4 sm:$0xff]  }
  0x65   :  { %500 = vmatpush1.bf16.msra.mxu1 %v1273_v25  ;;  %v1322_v25 = vld [vmem:[#allocation6 + $0x188] ss:$16 sps:$4 sm:$0xff]  }
  0x66   :  { %501 = vmatprep.subr.bf16.mxu1 %v1274_v26  ;;  %988 = vmatpush1.bf16.msra.mxu0 %v1360_v62  ;;  %v1327_v26 = vld [vmem:[#allocation6 + $0x1ac] ss:$16 sps:$4 sm:$0xff]   ;;  %v1391_v62 = vld [vmem:[#allocation8 + $0x130] ss:$8 sps:$4 sm:$0xff]  }
  0x67   :  { %989 = vmatprep.subr.bf16.mxu0 %v1361_v63  ;;  %v1396_v63 = vld [vmem:[#allocation8 + $0x144] ss:$8 sps:$4 sm:$0xff]  }
  0x69   :  { %502 = vmatpush1.bf16.msra.mxu1 %v1276_v30  ;;  %v1333_v30 = vld [vmem:[#allocation6 + $0x1ec] ss:$16 sps:$4 sm:$0xff]  }
  0x6a   :  { %503 = vmatprep.subr.bf16.mxu1 %v1277_v32  ;;  %990 = vmatpush1.bf16.msra.mxu0 %v1363_v2  ;;  %v1376_v32 = vld [vmem:[#allocation8 + $0xe4] ss:$8 sps:$4 sm:$0xff]   ;;  %v1397_v2 = vld [vmem:[#allocation8 + $0x150] ss:$8 sps:$4 sm:$0xff]  }
  0x6b   :  { %991 = vmatprep.subr.bf16.mxu0 %v1364_v3  ;;  %v1402_v3 = vld [vmem:[#allocation8 + $0x164] ss:$8 sps:$4 sm:$0xff]  }
  0x6d   :  { %504 = vmatpush1.bf16.msra.mxu1 %v1279_v34  ;;  %v1379_v34 = vld [vmem:[#allocation8 + $0xf4] ss:$8 sps:$4 sm:$0xff]  }
  0x6e   :  { %505 = vmatprep.subr.bf16.mxu1 %v1280_v36  ;;  %992 = vmatpush1.bf16.msra.mxu0 %v1366_v6  ;;  %v1384_v36 = vld [vmem:[#allocation8 + $0x104] ss:$8 sps:$4 sm:$0xff]   ;;  %v1403_v6 = vld [vmem:[#allocation8 + $0x170] ss:$8 sps:$4 sm:$0xff]  }
  0x6f   :  { %993 = vmatprep.subr.bf16.mxu0 %v1367_v7  ;;  %v1408_v7 = vld [vmem:[#allocation8 + $0x184] ss:$8 sps:$4 sm:$0xff]  }
  0x71   :  { %506 = vmatpush1.bf16.msra.mxu1 %v1282_v38  ;;  %v1616_v38 = vshrl.u32 %v137_v37, 7 }
  0x72   :  { %507 = vmatprep.subr.bf16.mxu1 %v1283_v40  ;;  %994 = vmatpush1.bf16.msra.mxu0 %v1369_v10  ;;  %v1624_v40 = vld [vmem:[%s1664_s2] sm:$0xf] }
  0x73   :  { %995 = vmatprep.subr.bf16.mxu0 %v1370_v11  ;;  %v1619_v39 = vsub.s32 0, %v1616_v38  ;;  %v1627_v41 = vsub.s32 1, %v1616_v38  ;;  %v1409_v10 = vld [vmem:[#allocation8 + $0x190] ss:$8 sps:$4 sm:$0xff]   ;;  %v1414_v11 = vld [vmem:[#allocation8 + $0x1a4] ss:$8 sps:$4 sm:$0xff]  }
  0x75   :  { %508 = vmatpush1.bf16.msra.mxu1 %v1285_v42  ;;  %v140_v42 = vrot.slane %v1624_v40, %v1619_v39  ;;  %v144_v43 = vrot.slane %v1624_v40, %v1627_v41 }
  0x76   :  { %518 = vmatprep.subr.bf16.mxu1 %v1288_v45 }
  0x78   :  { %510 = vmatmul.mubr.bf16.vlgmr.msra.gmra.mrb[0].mxu1 %v1611_v48 }
  0x79   :  { %519 = vmatpush1.bf16.msra.mxu1 %v1286_v47  ;;  %550 = vmatprep.mubr.bf16.mxu1 %v1608_v14  ;;  %v1372_v14 = vld [vmem:[#allocation8 + $0xc0] ss:$8 sps:$4 sm:$0xff]  }
  0x7a   :  { %520 = vmatprep.subr.bf16.mxu1 %v1291_v49  ;;  %996 = vmatpush1.bf16.msra.mxu0 %v1372_v14  ;;  %v1415_v14 = vld [vmem:[#allocation8 + $0x1b0] ss:$8 sps:$4 sm:$0xff]  }
  0x7b   :  { %997 = vmatprep.subr.bf16.mxu0 %v1373_v15  ;;  %v1420_v15 = vld [vmem:[#allocation8 + $0x1c4] ss:$8 sps:$4 sm:$0xff]  }
  0x7d   :  { %521 = vmatpush1.bf16.msra.mxu1 %v1289_v52 }
  0x7e   :  { %522 = vmatprep.subr.bf16.mxu1 %v1294_v53  ;;  %998 = vmatpush1.bf16.msra.mxu0 %v1375_v18  ;;  %v147_v18 = vsub.s32 2, %v1616_v38 }
  0x7f   :  { %999 = vmatprep.subr.bf16.mxu0 %v1376_v32 }
  0x81   :  { %523 = vmatpush1.bf16.msra.mxu1 %v1292_v56 }
  0x82   :  { %524 = vmatprep.subr.bf16.mxu1 %v1297_v57  ;;  %1000 = vmatpush1.bf16.msra.mxu0 %v1378_v33  ;;  %v1387_v57 = vld [vmem:[#allocation8 + $0x114] ss:$8 sps:$4 sm:$0xff]   ;;  %v1427_v33 = vld [vmem:[#allocation8 + $0x1f0] ss:$8 sps:$4 sm:$0xff]  }
  0x83   :  { %1001 = vmatprep.subr.bf16.mxu0 %v1379_v34 }
  0x85   :  { %525 = vmatpush1.bf16.msra.mxu1 %v1295_v60  ;;  %v1388_v60 = vld [vmem:[#allocation8 + $0x120] ss:$8 sps:$4 sm:$0xff]  }
  0x86   :  { %526 = vmatprep.subr.bf16.mxu1 %v1300_v61  ;;  %1002 = vmatpush1.bf16.msra.mxu0 %v1381_v35  ;;  %v1393_v61 = vld [vmem:[#allocation8 + $0x134] ss:$8 sps:$4 sm:$0xff]  }
  0x87   :  { %1012 = vmatprep.subr.bf16.mxu0 %v1384_v36 }
  0x89   :  { %527 = vmatpush1.bf16.msra.mxu1 %v1298_v0  ;;  %v1394_v0 = vld [vmem:[#allocation8 + $0x140] ss:$8 sps:$4 sm:$0xff]  }
  0x8a   :  { %528 = vmatprep.subr.bf16.mxu1 %v1303_v1  ;;  %v1399_v1 = vld [vmem:[#allocation8 + $0x154] ss:$8 sps:$4 sm:$0xff]  }
  0x8d   :  { %529 = vmatpush1.bf16.msra.mxu1 %v1301_v4  ;;  %v1400_v4 = vld [vmem:[#allocation8 + $0x160] ss:$8 sps:$4 sm:$0xff]  }
  0x8e   :  { %530 = vmatprep.subr.bf16.mxu1 %v1306_v5  ;;  %v1405_v5 = vld [vmem:[#allocation8 + $0x174] ss:$8 sps:$4 sm:$0xff]  }
  0x91   :  { %531 = vmatpush1.bf16.msra.mxu1 %v1304_v8  ;;  %v1406_v8 = vld [vmem:[#allocation8 + $0x180] ss:$8 sps:$4 sm:$0xff]  }
  0x92   :  { %532 = vmatprep.subr.bf16.mxu1 %v1309_v9  ;;  %v1411_v9 = vld [vmem:[#allocation8 + $0x194] ss:$8 sps:$4 sm:$0xff]  }
  0x95   :  { %533 = vmatpush1.bf16.msra.mxu1 %v1307_v12  ;;  %v1412_v12 = vld [vmem:[#allocation8 + $0x1a0] ss:$8 sps:$4 sm:$0xff]  }
  0x96   :  { %534 = vmatprep.subr.bf16.mxu1 %v1312_v13  ;;  %v1417_v13 = vld [vmem:[#allocation8 + $0x1b4] ss:$8 sps:$4 sm:$0xff]  }
  0x99   :  { %535 = vmatpush1.bf16.msra.mxu1 %v1310_v16  ;;  %v1418_v16 = vld [vmem:[#allocation8 + $0x1c0] ss:$8 sps:$4 sm:$0xff]  }
  0x9a   :  { %536 = vmatprep.subr.bf16.mxu1 %v1315_v17  ;;  %v1423_v17 = vld [vmem:[#allocation8 + $0x1d4] ss:$8 sps:$4 sm:$0xff]  }
  0x9d   :  { %537 = vmatpush1.bf16.msra.mxu1 %v1313_v19  ;;  %v151_v19 = vsub.s32 3, %v1616_v38 }
  0x9e   :  { %538 = vmatprep.subr.bf16.mxu1 %v1318_v20  ;;  %v1421_v20 = vld [vmem:[#allocation8 + $0x1d0] ss:$8 sps:$4 sm:$0xff]  }
  0xa1   :  { %539 = vmatpush1.bf16.msra.mxu1 %v1316_v21  ;;  %v1426_v21 = vld [vmem:[#allocation8 + $0x1e4] ss:$8 sps:$4 sm:$0xff]  }
  0xa2   :  { %540 = vmatprep.subr.bf16.mxu1 %v1321_v22  ;;  %v148_v22 = vrot.slane %v1624_v40, %v147_v18 }
  0xa5   :  { %541 = vmatpush1.bf16.msra.mxu1 %v1319_v23  ;;  %v152_v23 = vrot.slane %v1624_v40, %v151_v19  ;;  %v639_v40 = vld [vmem:[%s1666_s4] sm:$0x3] }
  0xa6   :  { %542 = vmatprep.subr.bf16.mxu1 %v1324_v24  ;;  %v1424_v24 = vld [vmem:[#allocation8 + $0x1e0] ss:$8 sps:$4 sm:$0xff]  }
  0xa9   :  { %543 = vmatpush1.bf16.msra.mxu1 %v1322_v25 }
  0xaa   :  { %544 = vmatprep.subr.bf16.mxu1 %v1327_v26  ;;  %v1429_v26 = vld [vmem:[#allocation8 + $0x1f4] ss:$8 sps:$4 sm:$0xff]  }
  0xad   :  { %545 = vmatpush1.bf16.msra.mxu1 %v1325_v27 }
  0xae   :  { %546 = vmatprep.subr.bf16.mxu1 %v1330_v28 }
  0xb1   :  { %547 = vmatpush1.bf16.msra.mxu1 %v1328_v29 }
  0xb2   :  { %548 = vmatprep.subr.bf16.mxu1 %v1333_v30 }
  0xb5   :  { %549 = vmatpush1.bf16.msra.mxu1 %v1331_v31 }
  0xb8   :  { %551 = vmatmul.mubr.bf16.vlgmr.msra.gmra.mrb[4].mxu1 %v1611_v48 }
 0x14b   :  { %v511_v44 = vpop.f32.mrb[0].mxu1 }
 0x14c   :  { %v512_v45 = vadd.f32 %v511_v44, %v140_v42  ;;  %v513_v46 = vpop.f32.mrb[1].mxu1  ;;  %v644_v42 = vrot.slane %v639_v40, %v1619_v39  ;;  %v1059_v44 = vld [vmem:[%s1667_s5] sm:$0x3] }
 0x14d   :  { %v514_v47 = vadd.f32 %v513_v46, %v144_v43  ;;  %v515_v48 = vpop.f32.mrb[2].mxu1  ;;  %v648_v43 = vrot.slane %v639_v40, %v1627_v41 }
 0x14e   :  { %vm559_vm0 = vcmp.gt.f32.partialorder %v512_v45, 0.0  ;;  %v563_v49 = vmul.f32 0.2, %v512_v45  ;;  %v516_v50 = vpop.f32.mrb[3].mxu1 }
 0x14f   :  { %vm560_vm1 = vcmp.gt.f32.partialorder %v514_v47, 0.0  ;;  %v564_v51 = vmul.f32 0.2, %v514_v47  ;;  %v1064_v50 = vrot.slane %v1059_v44, %v1619_v39 }
 0x150   :  { %v567_v52 = vsel %vm559_vm0, %v512_v45, %v563_v49 }
 0x151   :  { %v568_v53 = vsel %vm560_vm1, %v514_v47, %v564_v51  ;;  %v571_v56 = vpack.c.bf16 %v567_v52, %v567_v52 }
 0x152   :  { %v572_v54 = vpack.c.bf16 %v568_v53, %v568_v53  ;;  %v1068_v53 = vrot.slane %v1059_v44, %v1627_v41 }
 0x154   :  { %1003 = vmatprep.mubr.bf16.mxu0 %v572_v54 }
 0x155   :  { %1004 = vmatmul.mubr.bf16.vlgmr.msra.gmra.mrb[0].mxu0 %v571_v56 }
 0x156   :  { %1013 = vmatpush1.bf16.msra.mxu0 %v1382_v55 }
 0x157   :  { %1014 = vmatprep.subr.bf16.mxu0 %v1387_v57 }
 0x15a   :  { %1015 = vmatpush1.bf16.msra.mxu0 %v1385_v58 }
 0x15b   :  { %1016 = vmatprep.subr.bf16.mxu0 %v1390_v59 }
 0x15e   :  { %1017 = vmatpush1.bf16.msra.mxu0 %v1388_v60  ;;  %v1077_v60 = vstv %s1668_s6 }
 0x15f   :  { %1018 = vmatprep.subr.bf16.mxu0 %v1393_v61 }
 0x162   :  { %1019 = vmatpush1.bf16.msra.mxu0 %v1391_v62 }
 0x163   :  { %1020 = vmatprep.subr.bf16.mxu0 %v1396_v63 }
 0x166   :  { %1021 = vmatpush1.bf16.msra.mxu0 %v1394_v0 }
 0x167   :  { %1022 = vmatprep.subr.bf16.mxu0 %v1399_v1 }
 0x16a   :  { %1023 = vmatpush1.bf16.msra.mxu0 %v1397_v2 }
 0x16b   :  { %1024 = vmatprep.subr.bf16.mxu0 %v1402_v3 }
 0x16e   :  { %1025 = vmatpush1.bf16.msra.mxu0 %v1400_v4 }
 0x16f   :  { %1026 = vmatprep.subr.bf16.mxu0 %v1405_v5 }
 0x172   :  { %1027 = vmatpush1.bf16.msra.mxu0 %v1403_v6 }
 0x173   :  { %1028 = vmatprep.subr.bf16.mxu0 %v1408_v7 }
 0x176   :  { %1029 = vmatpush1.bf16.msra.mxu0 %v1406_v8 }
 0x177   :  { %1030 = vmatprep.subr.bf16.mxu0 %v1411_v9 }
 0x17a   :  { %1031 = vmatpush1.bf16.msra.mxu0 %v1409_v10 }
 0x17b   :  { %1032 = vmatprep.subr.bf16.mxu0 %v1414_v11 }
 0x17e   :  { %1033 = vmatpush1.bf16.msra.mxu0 %v1412_v12 }
 0x17f   :  { %1034 = vmatprep.subr.bf16.mxu0 %v1417_v13 }
 0x182   :  { %1035 = vmatpush1.bf16.msra.mxu0 %v1415_v14 }
 0x183   :  { %1036 = vmatprep.subr.bf16.mxu0 %v1420_v15 }
 0x186   :  { %1037 = vmatpush1.bf16.msra.mxu0 %v1418_v16 }
 0x187   :  { %1038 = vmatprep.subr.bf16.mxu0 %v1423_v17 }
 0x18a   :  { %1039 = vmatpush1.bf16.msra.mxu0 %v1421_v20 }
 0x18b   :  { %v552_v25 = vpop.f32.mrb[4].mxu1  ;;  %1040 = vmatprep.subr.bf16.mxu0 %v1426_v21 }
 0x18c   :  { %v553_v27 = vadd.f32 %v552_v25, %v148_v22  ;;  %v554_v28 = vpop.f32.mrb[5].mxu1 }
 0x18d   :  { %v555_v29 = vadd.f32 %v554_v28, %v152_v23  ;;  %v556_v30 = vpop.f32.mrb[6].mxu1 }
 0x18e   :  { %vm561_vm2 = vcmp.gt.f32.partialorder %v553_v27, 0.0  ;;  %v565_v31 = vmul.f32 0.2, %v553_v27  ;;  %v557_v32 = vpop.f32.mrb[7].mxu1  ;;  %1041 = vmatpush1.bf16.msra.mxu0 %v1424_v24 }
 0x18f   :  { %vm562_vm3 = vcmp.gt.f32.partialorder %v555_v29, 0.0  ;;  %v566_v34 = vmul.f32 0.2, %v555_v29  ;;  %1042 = vmatprep.subr.bf16.mxu0 %v1429_v26 }
 0x190   :  { %v569_v35 = vsel %vm561_vm2, %v553_v27, %v565_v31 }
 0x191   :  { %v570_v36 = vsel %vm562_vm3, %v555_v29, %v566_v34  ;;  %v573_v38 = vpack.c.bf16 %v569_v35, %v569_v35 }
 0x192   :  { %1043 = vmatpush1.bf16.msra.mxu0 %v1427_v33  ;;  %v574_v37 = vpack.c.bf16 %v570_v36, %v570_v36 }
 0x194   :  { %1044 = vmatprep.mubr.bf16.mxu0 %v574_v37 }
 0x195   :  { %1045 = vmatmul.mubr.bf16.vlgmr.msra.gmra.mrb[0].mxu0 %v573_v38 }
 0x268   :  { %v1046_v45 = vpop.f32.mrb[0].mxu0 }
 0x269   :  { %v1224_v46 = vadd.f32 %v1046_v45, %v644_v42  ;;  %v1048_v47 = vpop.f32.mrb[1].mxu0 }
 0x26a   :  { %v1225_v48 = vadd.f32 %v1048_v47, %v648_v43  ;;  %v1050_v49 = vpop.f32.mrb[2].mxu0 }
 0x26b   :  { %vm1053_vm4 = vcmp.gt.f32.partialorder %v1224_v46, 0.0  ;;  %v1055_v51 = vmul.f32 0.2, %v1224_v46  ;;  %v1051_v52 = vpop.f32.mrb[3].mxu0 }
 0x26c   :  { %vm1054_vm5 = vcmp.gt.f32.partialorder %v1225_v48, 0.0  ;;  %v1056_v54 = vmul.f32 0.2, %v1225_v48 }
 0x26d   :  { %v1057_v55 = vsel %vm1053_vm4, %v1224_v46, %v1055_v51 }
 0x26e   :  { %v1058_v56 = vsel %vm1054_vm5, %v1225_v48, %v1056_v54  ;;  %v1071_v57 = vmul.f32 %v1064_v50, %v1057_v55 }
 0x26f   :  { %v1072_v58 = vmul.f32 %v1068_v53, %v1058_v56 }
 0x271   :  { %v1073_v59 = vadd.f32 %v1072_v58, %v1071_v57 }
 0x273   :  { %1074 = vadd.xlane.f32.xlu0 %v1073_v59 }
 0x300   :  { %v1075_v39 = vpop.xlane.xlu0 %1074 }
 0x301   :  { %v1078_v61 = vadd.f32 %v1077_v60, %v1075_v39 }
 0x303   :  { %1079 = vst [vmem:[#allocation9] sm:$0xff] %v1078_v61 }
 0x304   :  { %1507 = shalt.err (!%p1504_p0)
}
 0x305   :  { %s1508_s26 = scalar_lea.hbm %s1669_s7, 128 }
 0x306   :  { %p1509_p1 = scmp.ne.s32.totalorder %s1669_s7, %s1508_s26  ;;  %p1512_p2 = scmp.lt.u32.totalorder %s1508_s26, %s1669_s7 }
 0x308   :  { %p1514_p3 = pnand %p1512_p2, %p1509_p1 }
 0x30a   :  { %1517 = shalt.err (!%p1514_p3)
}
 0x30b   :  { %1089 = dma.vmem_to_hbm [thread:$0]  %s1087_s21, 128, %s1669_s7, [#allocation5]  }
 0x30c   :  { %1522 = dma.done.wait [#allocation5], 128  }
 0x30d   :  { %1523 = vsyncadd [#allocation5], 4294967168 }
 0x30e   :  { %1093 = vsyncpa [#allocation4], 1 }
 0x30f   :  { %1094 = vsyncpa [#allocation7], 1 }
 0x310   :  { %1095 = vsyncpa [#allocation5], 1 }

</bundles_post_ra>
